<compile_context>
chip_gen: v7x
topology: tpu7x:2x2x1
jax: 0.10.0
libtpu: 0.0.40
codegen_flags: <defaults>
</compile_context>

<pallas_src>
import jax
import jax.numpy as jnp
from jax.experimental import pallas as pl
from jax.experimental.pallas import tpu as pltpu


# ----------------------------- kernels ------------------------------------ #

def _se_kernel_cf(x_ref, w1t_ref, w2t_ref, o_ref):
    """Channels-first block: x (Bt, C, HW); w1t (C, Cr) prescaled by 1/HW; w2t (Cr, C)."""
    # Global average pool: f32-accumulated sum over the lane (HW) axis; the 1/HW
    # factor was folded into w1t by the wrapper.
    pooled = jnp.sum(x_ref[...].astype(jnp.float32), axis=-1)          # (Bt, C) f32

    h = jnp.dot(pooled.astype(w1t_ref.dtype), w1t_ref[...],
                preferred_element_type=jnp.float32)                    # (Bt, Cr)
    h = jnp.maximum(h, 0.0)
    s = jax.nn.sigmoid(jnp.dot(h.astype(w2t_ref.dtype), w2t_ref[...],
                               preferred_element_type=jnp.float32))    # (Bt, C)

    # Residual scaling in the input's native dtype (only the gate is cast,
    # matching the torch module's dtype behaviour).
    scale = s.astype(x_ref.dtype)[:, :, None]                          # (Bt, C, 1)
    # Re-index x_ref here (instead of reusing a bound value across the matmul
    # region) so Mosaic never needs a persistent block-sized VMEM temporary.
    o_ref[...] = (x_ref[...] * scale).astype(o_ref.dtype)


def _se_kernel_cl(x_ref, w1t_ref, w2t_ref, o_ref):
    """Channels-last block: x (Bt, HW, C); C sits on lanes (lane-dense stores)."""
    pooled = jnp.sum(x_ref[...].astype(jnp.float32), axis=1)           # (Bt, C) f32

    h = jnp.dot(pooled.astype(w1t_ref.dtype), w1t_ref[...],
                preferred_element_type=jnp.float32)                    # (Bt, Cr)
    h = jnp.maximum(h, 0.0)
    s = jax.nn.sigmoid(jnp.dot(h.astype(w2t_ref.dtype), w2t_ref[...],
                               preferred_element_type=jnp.float32))    # (Bt, C)

    scale = s.astype(x_ref.dtype)[:, None, :]                          # (Bt, 1, C)
    o_ref[...] = (x_ref[...] * scale).astype(o_ref.dtype)


# ----------------------------- wrapper ------------------------------------- #

def _vmem_capacity_bytes():
    """Physical VMEM per TensorCore (64 MiB on v7x, 128 MiB on v5e/v6e)."""
    try:
        return int(pltpu.get_tpu_info().vmem_capacity_bytes)
    except Exception:
        return 64 << 20   # conservative fallback (v7x-sized)


def se_module_res(x, w_fc1, w_fc2, *, data_format="NCHW",
                  matmul_dtype=jnp.bfloat16, min_grid_steps=8,
                  block_bytes_target=None):
    """SE-with-residual-scaling forward.

    x: (B, C, H, W) when data_format="NCHW", or (B, H, W, C) when "NHWC".
    w_fc1: (C//r, C[, 1, 1]) fc1 1x1-conv weight; w_fc2: (C, C//r[, 1, 1]).
    Returns an array of x's shape and dtype.
    """
    if data_format == "NCHW":
        B, C, H, W = x.shape
    elif data_format == "NHWC":
        B, H, W, C = x.shape
    else:
        raise ValueError(f"unknown data_format {data_format!r}")
    HW = H * W
    dt = x.dtype
    itemsize = jnp.dtype(dt).itemsize

    w1 = jnp.asarray(w_fc1).reshape(w_fc1.shape[0], w_fc1.shape[1])   # (Cr, C)
    w2 = jnp.asarray(w_fc2).reshape(w_fc2.shape[0], w_fc2.shape[1])   # (C, Cr)
    Cr = w1.shape[0]

    # Fold the 1/HW of the mean into fc1 (in f32) and pre-transpose both weights
    # so the in-kernel matmuls are (Bt, C) @ (C, Cr) and (Bt, Cr) @ (Cr, C).
    # matmul_dtype=bf16 (default) cuts MXU push work ~3x and weight VMEM 2x.
    w1t = (w1.astype(jnp.float32).T * jnp.float32(1.0 / HW)).astype(matmul_dtype)  # (C, Cr)
    w2t = w2.astype(jnp.float32).T.astype(matmul_dtype)                            # (Cr, C)

    # ---- generation-aware tiling -----------------------------------------
    vmem_cap = _vmem_capacity_bytes()
    if block_bytes_target is None:
        # ~12.8 MiB/buffer on 128 MiB parts (v5e/v6e), ~6.4 MiB on 64 MiB (v7x);
        # 4 buffers in flight (2-in + 2-out) keeps us ~40% of capacity.
        block_bytes_target = vmem_cap // 10

    per_batch_bytes = C * HW * itemsize
    bt_bytes = max(1, block_bytes_target // per_batch_bytes)
    bt_steps = max(1, B // min_grid_steps)      # keep >= min_grid_steps steps when B allows
    bt = int(max(1, min(B, bt_bytes, bt_steps)))
    grid_steps = pl.cdiv(B, bt)                 # partial last block allowed; pad rows discarded
    block_bytes = bt * per_batch_bytes

    w_bytes = 2 * C * Cr * jnp.dtype(matmul_dtype).itemsize
    vmem_limit = 4 * block_bytes + 2 * w_bytes + (2 << 20)
    vmem_limit = int(min(max(vmem_limit, 16 << 20), int(vmem_cap * 0.85)))
    # TODO(synk): when a single (C, HW) plane x 4 buffers exceeds ~50% of VMEM
    # (e.g. C=2048, HW=3136 f32 on v7x), switch to an HW-tiled two-pass structure
    # (pool-accumulate over an "arbitrary" HW grid axis, then an apply pass)
    # instead of relying on a bt=1 mega-block.
    # TODO(synk): for v7x NCHW stages with HW < 128, a free (B, C, HW) ->
    # (B, C//k, k*HW) lane-fold with a segmented in-kernel reduce would make the
    # stores lane-dense without any extra HBM pass.

    if data_format == "NCHW":
        x_in = x.reshape(B, C, HW)              # contiguous reshape, free
        block = (bt, C, HW)
        kernel = _se_kernel_cf
    else:
        x_in = x.reshape(B, HW, C)              # contiguous reshape, free
        block = (bt, HW, C)
        kernel = _se_kernel_cl

    def _run(single_buffer_weights):
        if single_buffer_weights:
            # Grid-invariant weights: don't double-buffer them.
            def w_spec(shp):
                return pl.BlockSpec(shp, lambda b: (0, 0),
                                    pipeline_mode=pl.Buffered(1))
        else:
            def w_spec(shp):
                return pl.BlockSpec(shp, lambda b: (0, 0))
        return pl.pallas_call(
            kernel,
            out_shape=jax.ShapeDtypeStruct(x_in.shape, dt),
            grid_spec=pltpu.PrefetchScalarGridSpec(
                num_scalar_prefetch=0,
                grid=(grid_steps,),
                in_specs=[
                    pl.BlockSpec(block, lambda b: (b, 0, 0)),
                    w_spec((C, Cr)),
                    w_spec((Cr, C)),
                ],
                out_specs=pl.BlockSpec(block, lambda b: (b, 0, 0)),
            ),
            compiler_params=pltpu.CompilerParams(
                dimension_semantics=("parallel",),
                vmem_limit_bytes=vmem_limit,
            ),
        )(x_in, w1t, w2t)

    try:
        out = _run(True)
    except Exception:
        # pl.Buffered(1) not supported on this jax build: fall back to default
        # double-buffered weights (costs VMEM only; they are not re-DMA'd).
        out = _run(False)

    if data_format == "NCHW":
        return out.reshape(B, C, H, W)
    return out.reshape(B, H, W, C)


# ----------------------------- reference & test ---------------------------- #

def _reference_nchw(x, w1, w2):
    pooled = jnp.mean(x.astype(jnp.float32), axis=(2, 3))                # (B, C)
    h = jnp.maximum(pooled @ w1.astype(jnp.float32).T, 0.0)              # (B, Cr)
    s = jax.nn.sigmoid(h @ w2.astype(jnp.float32).T)                     # (B, C)
    return (x.astype(jnp.float32) * s[:, :, None, None]).astype(x.dtype)


if __name__ == "__main__":
    key = jax.random.PRNGKey(0)

    # Case 1: NCHW, exact f32 matmuls, tiny shapes, tight tolerance.
    B, C, H, W, red = 2, 8, 16, 16, 4
    Cr = C // red
    kx, k1, k2, key = jax.random.split(key, 4)
    x = jax.random.normal(kx, (B, C, H, W), dtype=jnp.float32)
    w_fc1 = jax.random.normal(k1, (Cr, C), dtype=jnp.float32) * (1.0 / jnp.sqrt(C))
    w_fc2 = jax.random.normal(k2, (C, Cr), dtype=jnp.float32) * (1.0 / jnp.sqrt(Cr))

    out = jax.block_until_ready(se_module_res(x, w_fc1, w_fc2, matmul_dtype=jnp.float32))
    ref = _reference_nchw(x, w_fc1, w_fc2)
    assert out.shape == (B, C, H, W)
    assert jnp.allclose(out, ref, atol=1e-5, rtol=1e-5), "mismatch (NCHW, f32 matmuls)"

    # Case 2: NCHW, default bf16 matmuls, HW < 128 (masked-store path),
    # B not divisible by the chosen batch tile (exercises cdiv padding).
    B2, C2, H2, W2, red2 = 17, 128, 7, 7, 4
    Cr2 = C2 // red2
    kx2, k12, k22, key = jax.random.split(key, 4)
    x2 = jax.random.normal(kx2, (B2, C2, H2, W2), dtype=jnp.float32)
    w1_2 = jax.random.normal(k12, (Cr2, C2), dtype=jnp.float32) * (1.0 / jnp.sqrt(C2))
    w2_2 = jax.random.normal(k22, (C2, Cr2), dtype=jnp.float32) * (1.0 / jnp.sqrt(Cr2))

    out2 = jax.block_until_ready(se_module_res(x2, w1_2, w2_2))
    ref2 = _reference_nchw(x2, w1_2, w2_2)
    assert out2.shape == (B2, C2, H2, W2)
    assert jnp.allclose(out2, ref2, atol=2e-2, rtol=2e-2), "mismatch (NCHW, bf16 matmuls)"

    # Case 3: native NHWC input (lane-dense stores, no wrapper transpose).
    B3, C3, H3, W3, red3 = 2, 128, 7, 7, 4
    Cr3 = C3 // red3
    kx3, k13, k23, key = jax.random.split(key, 4)
    x3 = jax.random.normal(kx3, (B3, H3, W3, C3), dtype=jnp.float32)
    w1_3 = jax.random.normal(k13, (Cr3, C3), dtype=jnp.float32) * (1.0 / jnp.sqrt(C3))
    w2_3 = jax.random.normal(k23, (C3, Cr3), dtype=jnp.float32) * (1.0 / jnp.sqrt(Cr3))

    out3 = jax.block_until_ready(se_module_res(x3, w1_3, w2_3, data_format="NHWC"))
    ref3 = jnp.transpose(
        _reference_nchw(jnp.transpose(x3, (0, 3, 1, 2)), w1_3, w2_3), (0, 2, 3, 1))
    assert out3.shape == (B3, H3, W3, C3)
    assert jnp.allclose(out3, ref3, atol=2e-2, rtol=2e-2), "mismatch (NHWC, bf16 matmuls)"

    print("KERNEL_OK")
</pallas_src>

<mosaic_0001>
module attributes {stable_mosaic.version = 11 : i64} {
  func.func @_se_kernel_cf(%arg0: i32, %arg1: memref<1x8x256xf32, #tpu.memory_space<vmem>>, %arg2: memref<8x2xf32, #tpu.memory_space<vmem>>, %arg3: memref<2x8xf32, #tpu.memory_space<vmem>>, %arg4: memref<1x8x256xf32, #tpu.memory_space<vmem>>) attributes {dimension_semantics = [#tpu.dimension_semantics<parallel>], iteration_bounds = array<i64: 2>, scalar_prefetch = 0 : i64, scratch_operands = 0 : i64, tpu.core_type = #tpu.core_type<tc>, window_params = [{transform_indices = @transform_0, window_bounds = array<i64: 1, 8, 256>}, {pipeline_mode = #tpu.pipeline_mode<synchronous>, transform_indices = @transform_1, window_bounds = array<i64: 8, 2>}, {pipeline_mode = #tpu.pipeline_mode<synchronous>, transform_indices = @transform_2, window_bounds = array<i64: 2, 8>}, {transform_indices = @transform_3, window_bounds = array<i64: 1, 8, 256>}]} {
    %c0 = arith.constant 0 : index
    %c0_0 = arith.constant 0 : index
    %c0_1 = arith.constant 0 : index
    %0 = vector.load %arg1[%c0, %c0_0, %c0_1] : memref<1x8x256xf32, #tpu.memory_space<vmem>>, vector<1x8x256xf32>
    %cst = arith.constant dense<0.000000e+00> : vector<1x8xf32>
    %1 = vector.multi_reduction <add>, %0, %cst [2] : vector<1x8x256xf32> to vector<1x8xf32>
    %c0_2 = arith.constant 0 : index
    %c0_3 = arith.constant 0 : index
    %2 = vector.load %arg2[%c0_2, %c0_3] : memref<8x2xf32, #tpu.memory_space<vmem>>, vector<8x2xf32>
    %cst_4 = arith.constant dense<0.000000e+00> : vector<1x2xf32>
    %3 = tpu.matmul %1, %2, %cst_4 {dimension_numbers = #tpu.dot_dimension_numbers<[1], [0], [0], [1], [0, 0, 1, 1], [], []>} : vector<1x8xf32>, vector<8x2xf32>, vector<1x2xf32> -> vector<1x2xf32>
    %cst_5 = arith.constant 0.000000e+00 : f32
    %4 = vector.broadcast %cst_5 : f32 to vector<1x2xf32>
    %5 = arith.maximumf %3, %4 : vector<1x2xf32>
    %c0_6 = arith.constant 0 : index
    %c0_7 = arith.constant 0 : index
    %6 = vector.load %arg3[%c0_6, %c0_7] : memref<2x8xf32, #tpu.memory_space<vmem>>, vector<2x8xf32>
    %cst_8 = arith.constant dense<0.000000e+00> : vector<1x8xf32>
    %7 = tpu.matmul %5, %6, %cst_8 {dimension_numbers = #tpu.dot_dimension_numbers<[1], [0], [0], [1], [0, 0, 1, 1], [], []>} : vector<1x2xf32>, vector<2x8xf32>, vector<1x8xf32> -> vector<1x8xf32>
    %8 = arith.negf %7 : vector<1x8xf32>
    %9 = math.exp %8 : vector<1x8xf32>
    %cst_9 = arith.constant 1.000000e+00 : f32
    %10 = vector.broadcast %cst_9 : f32 to vector<1x8xf32>
    %11 = arith.addf %10, %9 : vector<1x8xf32>
    %12 = arith.divf %10, %11 : vector<1x8xf32>
    %13 = vector.shape_cast %12 : vector<1x8xf32> to vector<1x8x1xf32>
    %c0_10 = arith.constant 0 : index
    %c0_11 = arith.constant 0 : index
    %c0_12 = arith.constant 0 : index
    %14 = vector.load %arg1[%c0_10, %c0_11, %c0_12] : memref<1x8x256xf32, #tpu.memory_space<vmem>>, vector<1x8x256xf32>
    %15 = vector.broadcast %13 : vector<1x8x1xf32> to vector<1x8x256xf32>
    %16 = arith.mulf %14, %15 : vector<1x8x256xf32>
    %c0_13 = arith.constant 0 : index
    %c0_14 = arith.constant 0 : index
    %c0_15 = arith.constant 0 : index
    %17 = vector.load %arg4[%c0_13, %c0_14, %c0_15] : memref<1x8x256xf32, #tpu.memory_space<vmem>>, vector<1x8x256xf32>
    tpu.vector_store %arg4[%c0_13, %c0_14, %c0_15], %16 {strides = array<i32>} : memref<1x8x256xf32, #tpu.memory_space<vmem>>, vector<1x8x256xf32>,
    return
  }
  func.func @transform_0(%arg0: i32) -> (i32, i32, i32) {
    %c0_i32 = arith.constant 0 : i32
    %c0_i32_0 = arith.constant 0 : i32
    %c0_i32_1 = arith.constant 0 : i32
    return %arg0, %c0_i32, %c0_i32_0 : i32, i32, i32
  }
  func.func @transform_1(%arg0: i32) -> (i32, i32) {
    %c0_i32 = arith.constant 0 : i32
    %c0_i32_0 = arith.constant 0 : i32
    %c0_i32_1 = arith.constant 0 : i32
    return %c0_i32, %c0_i32_0 : i32, i32
  }
  func.func @transform_2(%arg0: i32) -> (i32, i32) {
    %c0_i32 = arith.constant 0 : i32
    %c0_i32_0 = arith.constant 0 : i32
    %c0_i32_1 = arith.constant 0 : i32
    return %c0_i32, %c0_i32_0 : i32, i32
  }
  func.func @transform_3(%arg0: i32) -> (i32, i32, i32) {
    %c0_i32 = arith.constant 0 : i32
    %c0_i32_0 = arith.constant 0 : i32
    %c0_i32_1 = arith.constant 0 : i32
    return %arg0, %c0_i32, %c0_i32_0 : i32, i32, i32
  }
}

module attributes {stable_mosaic.version = 11 : i64} {
  func.func @_se_kernel_cf(%arg0: i32, %arg1: memref<1x8x256xf32, #tpu.memory_space<vmem>>, %arg2: memref<8x2xf32, #tpu.memory_space<vmem>>, %arg3: memref<2x8xf32, #tpu.memory_space<vmem>>, %arg4: memref<1x8x256xf32, #tpu.memory_space<vmem>>) attributes {dimension_semantics = [#tpu.dimension_semantics<parallel>], iteration_bounds = array<i64: 2>, scalar_prefetch = 0 : i64, scratch_operands = 0 : i64, tpu.core_type = #tpu.core_type<tc>, window_params = [{transform_indices = @transform_0, window_bounds = array<i64: 1, 8, 256>}, {pipeline_mode = #tpu.pipeline_mode<synchronous>, transform_indices = @transform_1, window_bounds = array<i64: 8, 2>}, {pipeline_mode = #tpu.pipeline_mode<synchronous>, transform_indices = @transform_2, window_bounds = array<i64: 2, 8>}, {transform_indices = @transform_3, window_bounds = array<i64: 1, 8, 256>}]} {
    %c0 = arith.constant 0 : index
    %c0_0 = arith.constant 0 : index
    %c0_1 = arith.constant 0 : index
    %0 = vector.load %arg1[%c0, %c0_0, %c0_1] : memref<1x8x256xf32, #tpu.memory_space<vmem>>, vector<1x8x256xf32>
    %cst = arith.constant dense<0.000000e+00> : vector<1x8xf32>
    %1 = vector.multi_reduction <add>, %0, %cst [2] : vector<1x8x256xf32> to vector<1x8xf32>
    %c0_2 = arith.constant 0 : index
    %c0_3 = arith.constant 0 : index
    %2 = vector.load %arg2[%c0_2, %c0_3] : memref<8x2xf32, #tpu.memory_space<vmem>>, vector<8x2xf32>
    %cst_4 = arith.constant dense<0.000000e+00> : vector<1x2xf32>
    %3 = tpu.matmul %1, %2, %cst_4 {dimension_numbers = #tpu.dot_dimension_numbers<[1], [0], [0], [1], [0, 0, 1, 1], [], []>} : vector<1x8xf32>, vector<8x2xf32>, vector<1x2xf32> -> vector<1x2xf32>
    %cst_5 = arith.constant 0.000000e+00 : f32
    %4 = vector.broadcast %cst_5 : f32 to vector<1x2xf32>
    %5 = arith.maximumf %3, %4 : vector<1x2xf32>
    %c0_6 = arith.constant 0 : index
    %c0_7 = arith.constant 0 : index
    %6 = vector.load %arg3[%c0_6, %c0_7] : memref<2x8xf32, #tpu.memory_space<vmem>>, vector<2x8xf32>
    %cst_8 = arith.constant dense<0.000000e+00> : vector<1x8xf32>
    %7 = tpu.matmul %5, %6, %cst_8 {dimension_numbers = #tpu.dot_dimension_numbers<[1], [0], [0], [1], [0, 0, 1, 1], [], []>} : vector<1x2xf32>, vector<2x8xf32>, vector<1x8xf32> -> vector<1x8xf32>
    %8 = arith.negf %7 : vector<1x8xf32>
    %9 = math.exp %8 : vector<1x8xf32>
    %cst_9 = arith.constant 1.000000e+00 : f32
    %10 = vector.broadcast %cst_9 : f32 to vector<1x8xf32>
    %11 = arith.addf %10, %9 : vector<1x8xf32>
    %12 = arith.divf %10, %11 : vector<1x8xf32>
    %13 = vector.shape_cast %12 : vector<1x8xf32> to vector<1x8x1xf32>
    %c0_10 = arith.constant 0 : index
    %c0_11 = arith.constant 0 : index
    %c0_12 = arith.constant 0 : index
    %14 = vector.load %arg1[%c0_10, %c0_11, %c0_12] : memref<1x8x256xf32, #tpu.memory_space<vmem>>, vector<1x8x256xf32>
    %15 = vector.broadcast %13 : vector<1x8x1xf32> to vector<1x8x256xf32>
    %16 = arith.mulf %14, %15 : vector<1x8x256xf32>
    %c0_13 = arith.constant 0 : index
    %c0_14 = arith.constant 0 : index
    %c0_15 = arith.constant 0 : index
    %17 = vector.load %arg4[%c0_13, %c0_14, %c0_15] : memref<1x8x256xf32, #tpu.memory_space<vmem>>, vector<1x8x256xf32>
    tpu.vector_store %arg4[%c0_13, %c0_14, %c0_15], %16 {strides = array<i32>} : memref<1x8x256xf32, #tpu.memory_space<vmem>>, vector<1x8x256xf32>,
    return
  }
  func.func @transform_0(%arg0: i32) -> (i32, i32, i32) {
    %c0_i32 = arith.constant 0 : i32
    %c0_i32_0 = arith.constant 0 : i32
    %c0_i32_1 = arith.constant 0 : i32
    return %arg0, %c0_i32, %c0_i32_0 : i32, i32, i32
  }
  func.func @transform_1(%arg0: i32) -> (i32, i32) {
    %c0_i32 = arith.constant 0 : i32
    %c0_i32_0 = arith.constant 0 : i32
    %c0_i32_1 = arith.constant 0 : i32
    return %c0_i32, %c0_i32_0 : i32, i32
  }
  func.func @transform_2(%arg0: i32) -> (i32, i32) {
    %c0_i32 = arith.constant 0 : i32
    %c0_i32_0 = arith.constant 0 : i32
    %c0_i32_1 = arith.constant 0 : i32
    return %c0_i32, %c0_i32_0 : i32, i32
  }
  func.func @transform_3(%arg0: i32) -> (i32, i32, i32) {
    %c0_i32 = arith.constant 0 : i32
    %c0_i32_0 = arith.constant 0 : i32
    %c0_i32_1 = arith.constant 0 : i32
    return %arg0, %c0_i32, %c0_i32_0 : i32, i32, i32
  }
}

</mosaic_0001>

<bundles_post_ra>
// kernel: tpu_custom_call.1
= control target key start
LH: loop header
LB: loop body
LE: loop exit
PB: predicated region body
PF: predicated region fallthrough
CT: control target
= control target key end

     0   :  { %8 = vsyncpa [#allocation3], 0  ;;  %s834_s0 = inlined_call_operand.hbm [shape: f32[2,8,256], index: 0, kind: input, shape index: {}]   ;;  %s835_s1 = inlined_call_operand.vmem [shape: f32[8,2], index: 1, kind: input, shape index: {}]   ;;  %s836_s2 = inlined_call_operand.vmem [shape: f32[2,8], index: 2, kind: input, shape index: {}]   ;;  %s837_s3 = inlined_call_operand.hbm [shape: f32[2,8,256], index: 3, kind: output, shape index: {}]  }
   0x1   :  { %10 = vsyncpa [#allocation3 + $0x1], 0 }
   0x2   :  { %11 = vsyncpa [#allocation4], 0 }
   0x3   :  { %13 = vsyncpa [#allocation4 + $0x1], 0  ;;  %s663_s12 = smov 0   ;;  %s665_s13 = smov 0  }
   0x4   :  { %s667_s14 = smov 0   ;;  %s669_s15 = smov 0  }
   0x5 LB: > { %s684_s16 = sadd.s32 4294967295, %s637_s15   ;;  %s455_s17 = sadd.s32 4294967294, %s637_s15   ;;  %s637_s15 = sphi %s669_s15, %s852_s15   ;;  %s633_s14 = sphi %s667_s14, %s851_s14   ;;  %s629_s13 = sphi %s665_s13, %s850_s13   ;;  %s625_s12 = sphi %s663_s12, %s849_s12  }
   0x6   : > { %s688_s18 = sadd.s32 1, %s637_s15   ;;  %s26_s19 = sadd.s32 1, %s633_s14 }
   0x7   : > { %s23_s20 = ssub.s32 %s637_s15, %s688_s18  ;;  %p33_p0 = scmp.ne.s32.totalorder %s633_s14, %s629_s13 }
   0x8   : > { %p24_p1 = scmp.eq.s32.totalorder %s23_s20, 0  ;;  %p34_p2 = scmp.eq.s32.totalorder %s637_s15, 0 }
   0x9   : > { %p39_p3 = scmp.ne.s32.totalorder %s629_s13, %s625_s12  ;;  %p40_p4 = scmp.eq.s32.totalorder %s684_s16, 0 }
   0xa   : > { %s700_s21 = scalar_select %p24_p1, %s633_s14, %s26_s19  }
   0xb   : > { %p702_p5 = por %p34_p2, %p33_p0  ;;  %p706_p6 = por %p40_p4, %p39_p3 }
   0xc   : > { %p105_p7 = scmp.eq.s32.totalorder %s684_s16, 1  ;;  %p111_p8 = scmp.eq.s32.totalorder %s455_s17, 1 }
   0xd   : > { %p501_p10 = scmp.lt.s32.totalorder %s637_s15, 2  ;;  %s137_s26 = sand.u32 1, %s633_s14  }
   0xe   : > { %p713_p11 = por %p105_p7, %p33_p0  ;;  %p717_p12 = por %p111_p8, %p39_p3 }
   0xf   : > { %s473_s27 = sshll.u32 %s637_s15, 8  ;;  %s458_s28 = sshll.u32 %s137_s26, 4 }
  0x10   : > { %s841_s24 = scalar_select %p713_p11, 1, 0 }
  0x11   : > { %s842_s25 = scalar_select %p717_p12, 1, 0 }
  0x12   : > { %s726_s4 = scalar_lea.hbm %s834_s0, %s473_s27  ;;  %s141_s5 = scalar_lea.vmem [#allocation2], %s458_s28 }
  0x13   : > { %s149_s6 = sshll.u32 %s141_s5, 4  ;;  %p730_p13 = pnand %p501_p10, %p702_p5  ;;  %s734_s6 = int_to_ptr.vmem [resolvable:$true] %s149_s6 }
  0x14   : > { %s138_s8 = scalar_lea.sflag [#allocation3], %s137_s26  ;;  %s541_s9 = scalar_lea.hbm %s726_s4, 256 }
  0x15   : > { %p542_p2 = scmp.ne.s32.totalorder %s726_s4, %s541_s9  ;;  %p543_p3 = pneg %p730_p13 }
  0x16   : > { %s546_s17 = scalar_lea.hbm %s834_s0, 512  ;;  %p547_p5 = scmp.lt.u32.totalorder %s726_s4, %s834_s0 }
  0x17   : > { %p544_p4 = pnand %p543_p3, %p542_p2  ;;  %p548_p8 = scmp.lt.u32.totalorder %s546_s17, %s541_s9 }
  0x18   : > { %p550_p9 = scmp.lt.u32.totalorder %s541_s9, %s726_s4 }
  0x19   : > { %p545_p7 = pneg %p544_p4  ;;  %p549_p10 = por %p548_p8, %p547_p5 }
  0x1b   : > { %p551_p0 = por %p550_p9, %p549_p10 }
  0x1d   : > { %p552_p1 = pnand %p551_p0, %p545_p7 }
  0x1f   : > { %555 = shalt.err (!%p552_p1)
}
  0x20   : > { %s556_s22 = scalar_lea.vmem %s734_s6, 256  ;;  %s639_s26 = smov [#allocation2]  }
  0x21   : > { %p557_p2 = scmp.ne.s32.totalorder %s734_s6, %s556_s22  ;;  %s561_s27 = sshll.u32 %s639_s26, 4  ;;  %s562_s27 = int_to_ptr.vmem [resolvable:$false] %s561_s27 }
  0x22   : > { %s563_s28 = scalar_lea.vmem %s562_s27, 512  ;;  %p564_p11 = scmp.lt.s32.totalorder %s734_s6, %s562_s27 }
  0x23   : > { %p559_p4 = pnand %p557_p2, %p543_p3  ;;  %p565_p5 = scmp.lt.s32.totalorder %s563_s28, %s556_s22 }
  0x25   : > { %p560_p12 = pneg %p559_p4  ;;  %p566_p8 = por %p565_p5, %p564_p11 }
  0x27   : > { %p567_p9 = pnand %p566_p8, %p560_p12 }
  0x29   : > { %570 = shalt.err (!%p567_p9)
}
  0x2a   : > { %496 = dma.hbm_to_vmem [thread:$0]  (!%p730_p13), %s726_s4, 256, %s734_s6, %s138_s8  }
  0x2b   : > { %p844_p0 = scmp.lt.s32.totalorder %s637_s15, 3  ;;  %p845_p1 = scmp.ge.s32.totalorder %s637_s15, 1 }
  0x2d   : > { %p155_p3 = pnand %p845_p1, %p844_p0 }
  0x2e   : > { %s768_s29 = sand.u32 (!%p155_p3), 1, %s629_s13  }
  0x2f   : > { %158 = sbr.rel (%p155_p3) target bundleno = 787 (0x313), region = 32  ;;  %s462_s30 = sshll.u32 (!%p155_p3), %s768_s29, 4 }
  0x30   : > { %s161_s5 = scalar_lea.sflag (!%p155_p3), [#allocation3], %s768_s29  ;;  %s164_s7 = scalar_lea.vmem (!%p155_p3), [#allocation2], %s462_s30 }
  0x36   : > { %616 = dma.done.wait (%p706_p6), %s161_s5, 256  }
  0x37   : > { %618 = vsyncadd (%p706_p6), %s161_s5, 4294967040  ;;  %v187_v0 = vld [vmem:[%s164_s7] sm:$0xff]  ;;  %v188_v1 = vld [vmem:[%s164_s7 + $0x8] sm:$0xff]  ;;  %v640_v3 = vmov 0.0   ;;  %vm641_vm0 = vmmov 0   ;;  %v194_v5 = vlaneseq  ;;  %vm200_vm1 = vcmask 64512  }
  0x38   : > { %v189_v2 = vadd.f32 %v188_v1, %v187_v0  ;;  %479 = vmatprep.subr.mxu0 %v640_v3  ;;  %v192_v4 = vld [vmem:[%s835_s1] sm:$0xff]  ;;  %484 = vmatprep.subr.mxu1 %v640_v3  ;;  %vm279_vm2 = vcmask 1041408   ;;  %vm275_vm3 = vcmask 15360   ;;  %s474_s9 = sshll.u32 %s684_s16, 8  ;;  %s186_s10 = scalar_lea.vmem [#allocation5], %s462_s30 }
  0x39   : > { %480 = vmatpush3.msra.mxu0 %v192_v4  ;;  %481 = vmatprep.mubr.msk.f32.mxu0 %vm641_vm0, %v640_v3  ;;  %v195_v6 = vand.u32 127, %v194_v5  ;;  %v197_v7 = vshrl.u32 %v194_v5, 7  ;;  %v274_v11 = vld [vmem:[%s836_s2] sm:$0x3]  ;;  %s385_s11 = sshll.u32 %s186_s10, 4  ;;  %s790_s20 = scalar_lea.hbm %s837_s3, %s474_s9  ;;  %s792_s11 = int_to_ptr.vmem [resolvable:$true] %s385_s11 }
  0x3a   : > { %190 = vadd.xlane.f32.xlu0 %v189_v2  ;;  %486 = vmatprep.mubr.msk.f32.mxu1 %vm641_vm0, %v640_v3  ;;  %s371_s22 = scalar_lea.sflag [#allocation4], %s768_s29  ;;  %s571_s16 = scalar_lea.vmem %s792_s11, 256 }
  0x3b   : > { %v198_v8 = vsub.s32 %v195_v6, %v197_v7  ;;  %485 = vmatpush3.msk.msra.mxu1 %vm279_vm2, %v274_v11  ;;  %v361_v20 = vsub.s32 0, %v197_v7  ;;  %p572_p6 = scmp.ne.s32.totalorder %s792_s11, %s571_s16  ;;  %p846_p11 = scmp.ne.s32.totalorder %s841_s24, 0 }
  0x3c   : > { %s642_s26 = smov [#allocation5]  }
  0x3d   : > { %p573_p12 = pnand %p572_p6, %p846_p11  ;;  %s575_s27 = sshll.u32 %s642_s26, 4  ;;  %s576_s27 = int_to_ptr.vmem [resolvable:$false] %s575_s27 }
  0x3e   : > { %s577_s28 = scalar_lea.vmem %s576_s27, 512  ;;  %p578_p7 = scmp.lt.s32.totalorder %s792_s11, %s576_s27 }
  0x3f   : > { %p574_p13 = pneg %p573_p12  ;;  %p579_p10 = scmp.lt.s32.totalorder %s577_s28, %s571_s16 }
  0x41   : > { %p580_p2 = por %p579_p10, %p578_p7 }
  0x43   : > { %p581_p4 = pnand %p580_p2, %p574_p13 }
  0xc7   : > { %v191_v9 = vpop.xlane.xlu0 %190 }
  0xc8   : > { %v199_v10 = vrot.slane %v191_v9, %v198_v8 }
  0xca   : > { %482 = vmatmul.mubr.msk.f32.vlgmr.msra.gmra.mrb[0].mxu0 %vm200_vm1, %v199_v10 }
 0x19d   : > { %v269_v12 = vpop.f32.mrb[0].mxu0 }
 0x19e   : > { %v273_v13 = vmax.f32 %v269_v12, 0.0  ;;  %v483_v14 = vpop.f32.mrb[1].mxu0 }
 0x1a0   : > { %487 = vmatmul.mubr.msk.f32.vlgmr.msra.gmra.mrb[0].mxu1 %vm275_vm3, %v273_v13 }
 0x273   : > { %v349_v15 = vpop.f32.mrb[0].mxu1 }
 0x274   : > { %v467_v16 = vmul.f32 -1.442695, %v349_v15  ;;  %v488_v17 = vpop.f32.mrb[1].mxu1 }
 0x276   : > { %537 = vpow2.f32 %v467_v16 }
 0x280   : > { %v538_v18 = vpop.eup %537 }
 0x281   : > { %v356_v19 = vadd.f32 1.0, %v538_v18 }
 0x283   : > { %539 = vrcp.f32 %v356_v19 }
 0x28d   : > { %v540_v21 = vpop.eup %539 }
 0x28e   : > { %v362_v22 = vrot.slane %v540_v21, %v361_v20 }
 0x290   : > { %364 = vbcast.lane.b32.xlu0 %v362_v22, 256 }
 0x302   : > { %v365_v23 = vpop.permute.xlu0 %364 }
 0x303   : > { %v366_v24 = vmul.f32 %v365_v23, %v187_v0  ;;  %v367_v25 = vmul.f32 %v365_v23, %v188_v1 }
 0x305   : > { %368 = vst [vmem:[%s186_s10] sm:$0xff] %v366_v24  ;;  %369 = vst [vmem:[%s186_s10 + $0x8] sm:$0xff] %v367_v25 }
 0x306   : > { %584 = shalt.err (!%p581_p4)
}
 0x307   : > { %s585_s29 = scalar_lea.hbm %s790_s20, 256  ;;  %s589_s7 = scalar_lea.hbm %s837_s3, 512 }
 0x308   : > { %p586_p5 = scmp.ne.s32.totalorder %s790_s20, %s585_s29  ;;  %p590_p0 = scmp.lt.u32.totalorder %s790_s20, %s837_s3 }
 0x309   : > { %p591_p1 = scmp.lt.u32.totalorder %s589_s7, %s585_s29  ;;  %p593_p6 = scmp.lt.u32.totalorder %s585_s29, %s790_s20 }
 0x30a   : > { %p587_p8 = pnand %p586_p5, %p846_p11 }
 0x30b   : > { %p592_p3 = por %p591_p1, %p590_p0 }
 0x30c   : > { %p588_p9 = pneg %p587_p8 }
 0x30d   : > { %p594_p12 = por %p593_p6, %p592_p3 }
 0x30f   : > { %p595_p13 = pnand %p594_p12, %p588_p9 }
 0x311   : > { %598 = shalt.err (!%p595_p13)
}
 0x312   : > { %491 = dma.vmem_to_hbm [thread:$0]  (%p846_p11), %s792_s11, 256, %s790_s20, %s371_s22  }
 0x313 PF: > { %s397_s23 = sand.u32 1, %s625_s12   ;;  %p847_p7 = scmp.ne.s32.totalorder %s842_s25, 0 }
 0x314   : > { %p848_p10 = scmp.ge.s32.totalorder %s637_s15, 2  ;;  %s398_s8 = scalar_lea.sflag [#allocation4], %s397_s23 }
 0x316   : > { %p498_p2 = pnand %p848_p10, %p847_p7 }
 0x318   : > { %620 = dma.done.wait (!%p498_p2), %s398_s8, 256  }
 0x319   : > { %622 = vsyncadd (!%p498_p2), %s398_s8, 4294967040  ;;  %p16_p4 = scmp.ge.s32.totalorder %s688_s18, 4   ;;  %s849_s12 = smov %s629_s13 }
 0x31a   : > { %s850_s13 = smov %s633_s14  ;;  %s851_s14 = smov %s700_s21 }
 0x31b   : > { %s852_s15 = smov %s688_s18  ;;  %18 = sbr.rel (!%p16_p4) target bundleno = 5 (0x5), region = 77 }
 0x322   :  { %403 = vsyncpa [#allocation3], 1 }
 0x323   :  { %405 = vsyncpa [#allocation3 + $0x1], 1 }
 0x324   :  { %406 = vsyncpa [#allocation4], 1 }
 0x325   :  { %408 = vsyncpa [#allocation4 + $0x1], 1 }

// kernel: tpu_custom_call.1
= control target key start
LH: loop header
LB: loop body
LE: loop exit
PB: predicated region body
PF: predicated region fallthrough
CT: control target
= control target key end

     0   :  { %8 = vsyncpa [#allocation3], 0  ;;  %s834_s0 = inlined_call_operand.hbm [shape: f32[2,8,256], index: 0, kind: input, shape index: {}]   ;;  %s835_s1 = inlined_call_operand.vmem [shape: f32[8,2], index: 1, kind: input, shape index: {}]   ;;  %s836_s2 = inlined_call_operand.vmem [shape: f32[2,8], index: 2, kind: input, shape index: {}]   ;;  %s837_s3 = inlined_call_operand.hbm [shape: f32[2,8,256], index: 3, kind: output, shape index: {}]  }
   0x1   :  { %10 = vsyncpa [#allocation3 + $0x1], 0 }
   0x2   :  { %11 = vsyncpa [#allocation4], 0 }
   0x3   :  { %13 = vsyncpa [#allocation4 + $0x1], 0  ;;  %s663_s12 = smov 0   ;;  %s665_s13 = smov 0  }
   0x4   :  { %s667_s14 = smov 0   ;;  %s669_s15 = smov 0  }
   0x5 LB: > { %s684_s16 = sadd.s32 4294967295, %s637_s15   ;;  %s455_s17 = sadd.s32 4294967294, %s637_s15   ;;  %s637_s15 = sphi %s669_s15, %s852_s15   ;;  %s633_s14 = sphi %s667_s14, %s851_s14   ;;  %s629_s13 = sphi %s665_s13, %s850_s13   ;;  %s625_s12 = sphi %s663_s12, %s849_s12  }
   0x6   : > { %s688_s18 = sadd.s32 1, %s637_s15   ;;  %s26_s19 = sadd.s32 1, %s633_s14 }
   0x7   : > { %s23_s20 = ssub.s32 %s637_s15, %s688_s18  ;;  %p33_p0 = scmp.ne.s32.totalorder %s633_s14, %s629_s13 }
   0x8   : > { %p24_p1 = scmp.eq.s32.totalorder %s23_s20, 0  ;;  %p34_p2 = scmp.eq.s32.totalorder %s637_s15, 0 }
   0x9   : > { %p39_p3 = scmp.ne.s32.totalorder %s629_s13, %s625_s12  ;;  %p40_p4 = scmp.eq.s32.totalorder %s684_s16, 0 }
   0xa   : > { %s700_s21 = scalar_select %p24_p1, %s633_s14, %s26_s19  }
   0xb   : > { %p702_p5 = por %p34_p2, %p33_p0  ;;  %p706_p6 = por %p40_p4, %p39_p3 }
   0xc   : > { %p105_p7 = scmp.eq.s32.totalorder %s684_s16, 1  ;;  %p111_p8 = scmp.eq.s32.totalorder %s455_s17, 1 }
   0xd   : > { %p501_p10 = scmp.lt.s32.totalorder %s637_s15, 2  ;;  %s137_s26 = sand.u32 1, %s633_s14  }
   0xe   : > { %p713_p11 = por %p105_p7, %p33_p0  ;;  %p717_p12 = por %p111_p8, %p39_p3 }
   0xf   : > { %s473_s27 = sshll.u32 %s637_s15, 8  ;;  %s458_s28 = sshll.u32 %s137_s26, 4 }
  0x10   : > { %s841_s24 = scalar_select %p713_p11, 1, 0 }
  0x11   : > { %s842_s25 = scalar_select %p717_p12, 1, 0 }
  0x12   : > { %s726_s4 = scalar_lea.hbm %s834_s0, %s473_s27  ;;  %s141_s5 = scalar_lea.vmem [#allocation2], %s458_s28 }
  0x13   : > { %s149_s6 = sshll.u32 %s141_s5, 4  ;;  %p730_p13 = pnand %p501_p10, %p702_p5  ;;  %s734_s6 = int_to_ptr.vmem [resolvable:$true] %s149_s6 }
  0x14   : > { %s138_s8 = scalar_lea.sflag [#allocation3], %s137_s26  ;;  %s541_s9 = scalar_lea.hbm %s726_s4, 256 }
  0x15   : > { %p542_p2 = scmp.ne.s32.totalorder %s726_s4, %s541_s9  ;;  %p543_p3 = pneg %p730_p13 }
  0x16   : > { %s546_s17 = scalar_lea.hbm %s834_s0, 512  ;;  %p547_p5 = scmp.lt.u32.totalorder %s726_s4, %s834_s0 }
  0x17   : > { %p544_p4 = pnand %p543_p3, %p542_p2  ;;  %p548_p8 = scmp.lt.u32.totalorder %s546_s17, %s541_s9 }
  0x18   : > { %p550_p9 = scmp.lt.u32.totalorder %s541_s9, %s726_s4 }
  0x19   : > { %p545_p7 = pneg %p544_p4  ;;  %p549_p10 = por %p548_p8, %p547_p5 }
  0x1b   : > { %p551_p0 = por %p550_p9, %p549_p10 }
  0x1d   : > { %p552_p1 = pnand %p551_p0, %p545_p7 }
  0x1f   : > { %555 = shalt.err (!%p552_p1)
}
  0x20   : > { %s556_s22 = scalar_lea.vmem %s734_s6, 256  ;;  %s639_s26 = smov [#allocation2]  }
  0x21   : > { %p557_p2 = scmp.ne.s32.totalorder %s734_s6, %s556_s22  ;;  %s561_s27 = sshll.u32 %s639_s26, 4  ;;  %s562_s27 = int_to_ptr.vmem [resolvable:$false] %s561_s27 }
  0x22   : > { %s563_s28 = scalar_lea.vmem %s562_s27, 512  ;;  %p564_p11 = scmp.lt.s32.totalorder %s734_s6, %s562_s27 }
  0x23   : > { %p559_p4 = pnand %p557_p2, %p543_p3  ;;  %p565_p5 = scmp.lt.s32.totalorder %s563_s28, %s556_s22 }
  0x25   : > { %p560_p12 = pneg %p559_p4  ;;  %p566_p8 = por %p565_p5, %p564_p11 }
  0x27   : > { %p567_p9 = pnand %p566_p8, %p560_p12 }
  0x29   : > { %570 = shalt.err (!%p567_p9)
}
  0x2a   : > { %496 = dma.hbm_to_vmem [thread:$0]  (!%p730_p13), %s726_s4, 256, %s734_s6, %s138_s8  }
  0x2b   : > { %p844_p0 = scmp.lt.s32.totalorder %s637_s15, 3  ;;  %p845_p1 = scmp.ge.s32.totalorder %s637_s15, 1 }
  0x2d   : > { %p155_p3 = pnand %p845_p1, %p844_p0 }
  0x2e   : > { %s768_s29 = sand.u32 (!%p155_p3), 1, %s629_s13  }
  0x2f   : > { %158 = sbr.rel (%p155_p3) target bundleno = 787 (0x313), region = 32  ;;  %s462_s30 = sshll.u32 (!%p155_p3), %s768_s29, 4 }
  0x30   : > { %s161_s5 = scalar_lea.sflag (!%p155_p3), [#allocation3], %s768_s29  ;;  %s164_s7 = scalar_lea.vmem (!%p155_p3), [#allocation2], %s462_s30 }
  0x36   : > { %616 = dma.done.wait (%p706_p6), %s161_s5, 256  }
  0x37   : > { %618 = vsyncadd (%p706_p6), %s161_s5, 4294967040  ;;  %v187_v0 = vld [vmem:[%s164_s7] sm:$0xff]  ;;  %v188_v1 = vld [vmem:[%s164_s7 + $0x8] sm:$0xff]  ;;  %v640_v3 = vmov 0.0   ;;  %vm641_vm0 = vmmov 0   ;;  %v194_v5 = vlaneseq  ;;  %vm200_vm1 = vcmask 64512  }
  0x38   : > { %v189_v2 = vadd.f32 %v188_v1, %v187_v0  ;;  %479 = vmatprep.subr.mxu0 %v640_v3  ;;  %v192_v4 = vld [vmem:[%s835_s1] sm:$0xff]  ;;  %484 = vmatprep.subr.mxu1 %v640_v3  ;;  %vm279_vm2 = vcmask 1041408   ;;  %vm275_vm3 = vcmask 15360   ;;  %s474_s9 = sshll.u32 %s684_s16, 8  ;;  %s186_s10 = scalar_lea.vmem [#allocation5], %s462_s30 }
  0x39   : > { %480 = vmatpush3.msra.mxu0 %v192_v4  ;;  %481 = vmatprep.mubr.msk.f32.mxu0 %vm641_vm0, %v640_v3  ;;  %v195_v6 = vand.u32 127, %v194_v5  ;;  %v197_v7 = vshrl.u32 %v194_v5, 7  ;;  %v274_v11 = vld [vmem:[%s836_s2] sm:$0x3]  ;;  %s385_s11 = sshll.u32 %s186_s10, 4  ;;  %s790_s20 = scalar_lea.hbm %s837_s3, %s474_s9  ;;  %s792_s11 = int_to_ptr.vmem [resolvable:$true] %s385_s11 }
  0x3a   : > { %190 = vadd.xlane.f32.xlu0 %v189_v2  ;;  %486 = vmatprep.mubr.msk.f32.mxu1 %vm641_vm0, %v640_v3  ;;  %s371_s22 = scalar_lea.sflag [#allocation4], %s768_s29  ;;  %s571_s16 = scalar_lea.vmem %s792_s11, 256 }
  0x3b   : > { %v198_v8 = vsub.s32 %v195_v6, %v197_v7  ;;  %485 = vmatpush3.msk.msra.mxu1 %vm279_vm2, %v274_v11  ;;  %v361_v20 = vsub.s32 0, %v197_v7  ;;  %p572_p6 = scmp.ne.s32.totalorder %s792_s11, %s571_s16  ;;  %p846_p11 = scmp.ne.s32.totalorder %s841_s24, 0 }
  0x3c   : > { %s642_s26 = smov [#allocation5]  }
  0x3d   : > { %p573_p12 = pnand %p572_p6, %p846_p11  ;;  %s575_s27 = sshll.u32 %s642_s26, 4  ;;  %s576_s27 = int_to_ptr.vmem [resolvable:$false] %s575_s27 }
  0x3e   : > { %s577_s28 = scalar_lea.vmem %s576_s27, 512  ;;  %p578_p7 = scmp.lt.s32.totalorder %s792_s11, %s576_s27 }
  0x3f   : > { %p574_p13 = pneg %p573_p12  ;;  %p579_p10 = scmp.lt.s32.totalorder %s577_s28, %s571_s16 }
  0x41   : > { %p580_p2 = por %p579_p10, %p578_p7 }
  0x43   : > { %p581_p4 = pnand %p580_p2, %p574_p13 }
  0xc7   : > { %v191_v9 = vpop.xlane.xlu0 %190 }
  0xc8   : > { %v199_v10 = vrot.slane %v191_v9, %v198_v8 }
  0xca   : > { %482 = vmatmul.mubr.msk.f32.vlgmr.msra.gmra.mrb[0].mxu0 %vm200_vm1, %v199_v10 }
 0x19d   : > { %v269_v12 = vpop.f32.mrb[0].mxu0 }
 0x19e   : > { %v273_v13 = vmax.f32 %v269_v12, 0.0  ;;  %v483_v14 = vpop.f32.mrb[1].mxu0 }
 0x1a0   : > { %487 = vmatmul.mubr.msk.f32.vlgmr.msra.gmra.mrb[0].mxu1 %vm275_vm3, %v273_v13 }
 0x273   : > { %v349_v15 = vpop.f32.mrb[0].mxu1 }
 0x274   : > { %v467_v16 = vmul.f32 -1.442695, %v349_v15  ;;  %v488_v17 = vpop.f32.mrb[1].mxu1 }
 0x276   : > { %537 = vpow2.f32 %v467_v16 }
 0x280   : > { %v538_v18 = vpop.eup %537 }
 0x281   : > { %v356_v19 = vadd.f32 1.0, %v538_v18 }
 0x283   : > { %539 = vrcp.f32 %v356_v19 }
 0x28d   : > { %v540_v21 = vpop.eup %539 }
 0x28e   : > { %v362_v22 = vrot.slane %v540_v21, %v361_v20 }
 0x290   : > { %364 = vbcast.lane.b32.xlu0 %v362_v22, 256 }
 0x302   : > { %v365_v23 = vpop.permute.xlu0 %364 }
 0x303   : > { %v366_v24 = vmul.f32 %v365_v23, %v187_v0  ;;  %v367_v25 = vmul.f32 %v365_v23, %v188_v1 }
 0x305   : > { %368 = vst [vmem:[%s186_s10] sm:$0xff] %v366_v24  ;;  %369 = vst [vmem:[%s186_s10 + $0x8] sm:$0xff] %v367_v25 }
 0x306   : > { %584 = shalt.err (!%p581_p4)
}
 0x307   : > { %s585_s29 = scalar_lea.hbm %s790_s20, 256  ;;  %s589_s7 = scalar_lea.hbm %s837_s3, 512 }
 0x308   : > { %p586_p5 = scmp.ne.s32.totalorder %s790_s20, %s585_s29  ;;  %p590_p0 = scmp.lt.u32.totalorder %s790_s20, %s837_s3 }
 0x309   : > { %p591_p1 = scmp.lt.u32.totalorder %s589_s7, %s585_s29  ;;  %p593_p6 = scmp.lt.u32.totalorder %s585_s29, %s790_s20 }
 0x30a   : > { %p587_p8 = pnand %p586_p5, %p846_p11 }
 0x30b   : > { %p592_p3 = por %p591_p1, %p590_p0 }
 0x30c   : > { %p588_p9 = pneg %p587_p8 }
 0x30d   : > { %p594_p12 = por %p593_p6, %p592_p3 }
 0x30f   : > { %p595_p13 = pnand %p594_p12, %p588_p9 }
 0x311   : > { %598 = shalt.err (!%p595_p13)
}
 0x312   : > { %491 = dma.vmem_to_hbm [thread:$0]  (%p846_p11), %s792_s11, 256, %s790_s20, %s371_s22  }
 0x313 PF: > { %s397_s23 = sand.u32 1, %s625_s12   ;;  %p847_p7 = scmp.ne.s32.totalorder %s842_s25, 0 }
 0x314   : > { %p848_p10 = scmp.ge.s32.totalorder %s637_s15, 2  ;;  %s398_s8 = scalar_lea.sflag [#allocation4], %s397_s23 }
 0x316   : > { %p498_p2 = pnand %p848_p10, %p847_p7 }
 0x318   : > { %620 = dma.done.wait (!%p498_p2), %s398_s8, 256  }
 0x319   : > { %622 = vsyncadd (!%p498_p2), %s398_s8, 4294967040  ;;  %p16_p4 = scmp.ge.s32.totalorder %s688_s18, 4   ;;  %s849_s12 = smov %s629_s13 }
 0x31a   : > { %s850_s13 = smov %s633_s14  ;;  %s851_s14 = smov %s700_s21 }
 0x31b   : > { %s852_s15 = smov %s688_s18  ;;  %18 = sbr.rel (!%p16_p4) target bundleno = 5 (0x5), region = 77 }
 0x322   :  { %403 = vsyncpa [#allocation3], 1 }
 0x323   :  { %405 = vsyncpa [#allocation3 + $0x1], 1 }
 0x324   :  { %406 = vsyncpa [#allocation4], 1 }
 0x325   :  { %408 = vsyncpa [#allocation4 + $0x1], 1 }

</bundles_post_ra>
